<compile_context>
chip_gen: v6e
topology: v6e:2x2x1
jax: 0.10.0
libtpu: 0.0.40
codegen_flags: <defaults>
</compile_context>

<pallas_src>
import functools

import jax
import jax.numpy as jnp
from jax.experimental import pallas as pl
from jax.experimental.pallas import tpu as pltpu


def _spectral_normalize(w_oihw, u, eps=1e-12):
    """Mirror SpectralNorm.compute_weight (the forward pre-hook).

    Returns (weight_sn, u_new); PyTorch writes u_new back into the module's
    `weight_u` buffer each forward, so callers should carry it.
    """
    cout = w_oihw.shape[0]
    w_mat = w_oihw.reshape(cout, -1)                       # (Cout, Cin*K*K)
    v = w_mat.T @ u
    v = v / jnp.maximum(jnp.linalg.norm(v), eps)
    u_new = w_mat @ v
    u_new = u_new / jnp.maximum(jnp.linalg.norm(u_new), eps)
    sigma = (u_new.T @ w_mat @ v)[0, 0]
    return w_oihw / sigma, u_new


def _convsn_matmul_kernel(w_ref, b_ref, rhs_ref, o_ref, *, neg_slope):
    """Lane-dense GEMM + bias + LeakyReLU(0.2) epilogue.

    w_ref  : (Cout, Kc_pad)    spectral-normalized weight, tap-major, K zero-padded
    b_ref  : (Cout, 1)         bias
    rhs_ref: (Kc_pad, tile_L)  im2col columns; lanes = batch * output pixels
    o_ref  : (Cout, tile_L)    lane-dense output tile
    """
    acc = jnp.dot(w_ref[...], rhs_ref[...], preferred_element_type=jnp.float32)
    acc = acc + b_ref[...].astype(jnp.float32)
    # Fused LeakyReLU — pure VPU select/mul, no transcendentals.
    o_ref[...] = jnp.where(acc >= 0.0, acc, neg_slope * acc).astype(o_ref.dtype)


def convsn_pallas(x_nchw, w_oihw, bias, u, *, stride=2, negative_slope=0.2,
                  use_bf16=False):
    """Forward of ConvSN.

    x_nchw: (N, Cin, H, W) float32
    w_oihw: (Cout, Cin, K, K) float32 (pre-spectral-norm Conv2d weight)
    bias  : (Cout,) float32
    u     : (Cout, 1) float32 (SpectralNorm `u` buffer)
    returns: (out, u_new) with out (N, Cout, Ho, Wo), Ho = (H+2p-K)//2 + 1.
    """
    N, Cin, H, W = x_nchw.shape
    Cout, _, K, _ = w_oihw.shape
    assert stride == 2 and K % 2 == 1, "specialised for the module config"
    pad = (K - 1) // 2                                     # 'auto' padding

    Ho = (H + 2 * pad - K) // stride + 1
    Wo = (W + 2 * pad - K) // stride + 1

    LANE = 128
    Kc = K * K * Cin                                       # 100
    Kc_pad = LANE * pl.cdiv(Kc, LANE)                      # 128: aligned MXU K
    L = N * Ho * Wo                                        # batch fused into lanes
    L_pad = LANE * pl.cdiv(L, LANE)
    tile_L = min(L_pad, 512)                               # lane-dense output tile
    L_pad = tile_L * pl.cdiv(L_pad, tile_L)
    grid_l = L_pad // tile_L

    # --- weight prep (tiny, plain JAX): spectral norm + tap-major flatten ---
    w_sn, u_new = _spectral_normalize(w_oihw, u)
    # w_flat[co, (dy*K + dx)*Cin + ci] = w_sn[co, ci, dy, dx]
    w_flat = jnp.transpose(w_sn, (0, 2, 3, 1)).reshape(Cout, Kc)
    w_p = jnp.pad(w_flat, ((0, 0), (0, Kc_pad - Kc)))
    b2 = bias.reshape(Cout, 1).astype(jnp.float32)

    # --- wrapper-side im2col (lane-flattened; ~64 KB at this config) --------
    # rhs[(dy*K+dx)*Cin + ci, n*Ho*Wo + i*Wo + j] = xpad[n, ci, 2i+dy, 2j+dx]
    xp = jnp.pad(x_nchw, ((0, 0), (0, 0), (pad, pad), (pad, pad)))
    taps = []
    for dy in range(K):
        for dx in range(K):
            taps.append(xp[:, :,
                           dy:dy + stride * (Ho - 1) + 1:stride,
                           dx:dx + stride * (Wo - 1) + 1:stride])
    rhs = jnp.stack(taps, axis=0)            # (K*K, N, Cin, Ho, Wo)
    rhs = rhs.transpose(0, 2, 1, 3, 4)       # (K*K, Cin, N, Ho, Wo)
    rhs = rhs.reshape(Kc, L)
    rhs = jnp.pad(rhs, ((0, Kc_pad - Kc), (0, L_pad - L)))

    mxu_dtype = jnp.bfloat16 if use_bf16 else x_nchw.dtype
    w_p = w_p.astype(mxu_dtype)
    rhs = rhs.astype(mxu_dtype)

    kernel = functools.partial(_convsn_matmul_kernel, neg_slope=negative_slope)

    itemsize = jnp.dtype(mxu_dtype).itemsize
    cost = pl.CostEstimate(
        flops=2 * Cout * Kc * L + 2 * Cout * L,            # GEMM + bias/LeakyReLU
        transcendentals=0,
        bytes_accessed=((Cout * Kc_pad + Kc_pad * L_pad) * itemsize
                        + Cout * 4 + Cout * L_pad * 4),
    )

    out_flat = pl.pallas_call(
        kernel,
        out_shape=jax.ShapeDtypeStruct((Cout, L_pad), x_nchw.dtype),
        grid_spec=pltpu.PrefetchScalarGridSpec(
            num_scalar_prefetch=0,
            grid=(grid_l,),
            in_specs=[
                pl.BlockSpec((Cout, Kc_pad), lambda l: (0, 0)),
                pl.BlockSpec((Cout, 1), lambda l: (0, 0)),
                pl.BlockSpec((Kc_pad, tile_L), lambda l: (0, l)),
            ],
            out_specs=pl.BlockSpec((Cout, tile_L), lambda l: (0, l)),
        ),
        compiler_params=pltpu.CompilerParams(
            dimension_semantics=("parallel",),
        ),
        cost_estimate=cost,
    )(w_p, b2, rhs)

    # Layout plumbing only: drop lane padding, split lanes back to (N, Ho, Wo).
    out = out_flat[:, :L].reshape(Cout, N, Ho, Wo).transpose(1, 0, 2, 3)
    return out, u_new


def convsn_reference(x_nchw, w_oihw, bias, u, *, stride=2, negative_slope=0.2):
    """Pure-JAX reference mirroring the PyTorch forward."""
    K = w_oihw.shape[2]
    pad = (K - 1) // 2
    w_sn, u_new = _spectral_normalize(w_oihw, u)
    y = jax.lax.conv_general_dilated(
        x_nchw, w_sn,
        window_strides=(stride, stride),
        padding=((pad, pad), (pad, pad)),
        dimension_numbers=("NCHW", "OIHW", "NCHW"),
        precision=jax.lax.Precision.HIGHEST,
    )
    y = y + bias.reshape(1, -1, 1, 1)
    return jax.nn.leaky_relu(y, negative_slope), u_new


if __name__ == "__main__":
    # Module config: ConvSN(in_channels=4, out_channels=8) -> k=5, stride=2, pad=2
    in_channels, out_channels = 4, 8
    kernel_size, stride = 5, 2
    N, H, W = 2, 16, 16

    key = jax.random.PRNGKey(0)
    kx, kw, kb, ku = jax.random.split(key, 4)
    x = jax.random.normal(kx, (N, in_channels, H, W), dtype=jnp.float32)
    w = 0.1 * jax.random.normal(
        kw, (out_channels, in_channels, kernel_size, kernel_size), jnp.float32)
    b = 0.05 * jax.random.normal(kb, (out_channels,), jnp.float32)
    # SpectralNorm buffer: u = torch.randn(out_channels, 1) * 0.1
    u = 0.1 * jax.random.normal(ku, (out_channels, 1), jnp.float32)

    out, u_new = jax.block_until_ready(jax.jit(convsn_pallas)(x, w, b, u))
    ref, u_ref = convsn_reference(x, w, b, u)
    ref = jax.block_until_ready(ref)

    Ho = (H + 2 * 2 - kernel_size) // stride + 1
    assert out.shape == (N, out_channels, Ho, Ho), out.shape
    max_err = float(jnp.max(jnp.abs(out - ref)))
    assert jnp.allclose(out, ref, atol=1e-4, rtol=1e-4), max_err
    assert jnp.allclose(u_new, u_ref, atol=1e-5, rtol=1e-5)

    print("KERNEL_OK")
</pallas_src>

<mosaic_0001>
module attributes {stable_mosaic.version = 11 : i64} {
  func.func @_convsn_matmul_kernel(%arg0: i32, %arg1: memref<8x128xf32, #tpu.memory_space<vmem>>, %arg2: memref<8x1xf32, #tpu.memory_space<vmem>>, %arg3: memref<128x128xf32, #tpu.memory_space<vmem>>, %arg4: memref<8x128xf32, #tpu.memory_space<vmem>>) attributes {dimension_semantics = [#tpu.dimension_semantics<parallel>], iteration_bounds = array<i64: 1>, scalar_prefetch = 0 : i64, scratch_operands = 0 : i64, tpu.core_type = #tpu.core_type<tc>, window_params = [{pipeline_mode = #tpu.pipeline_mode<synchronous>, transform_indices = @transform_0, window_bounds = array<i64: 8, 128>}, {pipeline_mode = #tpu.pipeline_mode<synchronous>, transform_indices = @transform_1, window_bounds = array<i64: 8, 1>}, {transform_indices = @transform_2, window_bounds = array<i64: 128, 128>}, {transform_indices = @transform_3, window_bounds = array<i64: 8, 128>}]} {
    %c0 = arith.constant 0 : index
    %c0_0 = arith.constant 0 : index
    %0 = vector.load %arg1[%c0, %c0_0] : memref<8x128xf32, #tpu.memory_space<vmem>>, vector<8x128xf32>
    %c0_1 = arith.constant 0 : index
    %c0_2 = arith.constant 0 : index
    %1 = vector.load %arg3[%c0_1, %c0_2] : memref<128x128xf32, #tpu.memory_space<vmem>>, vector<128x128xf32>
    %cst = arith.constant dense<0.000000e+00> : vector<8x128xf32>
    %2 = tpu.matmul %0, %1, %cst {dimension_numbers = #tpu.dot_dimension_numbers<[1], [0], [0], [1], [0, 0, 1, 1], [], []>} : vector<8x128xf32>, vector<128x128xf32>, vector<8x128xf32> -> vector<8x128xf32>
    %c0_3 = arith.constant 0 : index
    %c0_4 = arith.constant 0 : index
    %3 = vector.load %arg2[%c0_3, %c0_4] : memref<8x1xf32, #tpu.memory_space<vmem>>, vector<8x1xf32>
    %4 = vector.broadcast %3 : vector<8x1xf32> to vector<8x128xf32>
    %5 = arith.addf %2, %4 : vector<8x128xf32>
    %cst_5 = arith.constant 0.000000e+00 : f32
    %6 = vector.broadcast %cst_5 : f32 to vector<8x128xf32>
    %7 = arith.cmpf oge, %5, %6 : vector<8x128xf32>
    %cst_6 = arith.constant 2.000000e-01 : f32
    %8 = vector.broadcast %cst_6 : f32 to vector<8x128xf32>
    %9 = arith.mulf %8, %5 : vector<8x128xf32>
    %10 = arith.select %7, %5, %9 : vector<8x128xi1>, vector<8x128xf32>
    %c0_7 = arith.constant 0 : index
    %c0_8 = arith.constant 0 : index
    %11 = vector.load %arg4[%c0_7, %c0_8] : memref<8x128xf32, #tpu.memory_space<vmem>>, vector<8x128xf32>
    tpu.vector_store %arg4[%c0_7, %c0_8], %10 {strides = array<i32>} : memref<8x128xf32, #tpu.memory_space<vmem>>, vector<8x128xf32>,
    return
  }
  func.func @transform_0(%arg0: i32) -> (i32, i32) {
    %c0_i32 = arith.constant 0 : i32
    %c0_i32_0 = arith.constant 0 : i32
    %c0_i32_1 = arith.constant 0 : i32
    return %c0_i32, %c0_i32_0 : i32, i32
  }
  func.func @transform_1(%arg0: i32) -> (i32, i32) {
    %c0_i32 = arith.constant 0 : i32
    %c0_i32_0 = arith.constant 0 : i32
    %c0_i32_1 = arith.constant 0 : i32
    return %c0_i32, %c0_i32_0 : i32, i32
  }
  func.func @transform_2(%arg0: i32) -> (i32, i32) {
    %c0_i32 = arith.constant 0 : i32
    %c0_i32_0 = arith.constant 0 : i32
    return %c0_i32, %arg0 : i32, i32
  }
  func.func @transform_3(%arg0: i32) -> (i32, i32) {
    %c0_i32 = arith.constant 0 : i32
    %c0_i32_0 = arith.constant 0 : i32
    return %c0_i32, %arg0 : i32, i32
  }
}

</mosaic_0001>

<bundles_post_ra>
// kernel: convsn_pallas.1
= control target key start
LH: loop header
LB: loop body
LE: loop exit
PB: predicated region body
PF: predicated region fallthrough
CT: control target
= control target key end

     0   :  { %v171_v0 = vmov 0.0   ;;  %vm172_vm0 = vmmov 0   ;;  %v173_v3 = vmov 0   ;;  %s251_s2 = inlined_call_operand.vmem [shape: f32[128,128], index: 2, kind: input, shape index: {}]   ;;  %s252_s1 = inlined_call_operand.vmem [shape: f32[8,1], index: 1, kind: input, shape index: {}]   ;;  %s253_s0 = inlined_call_operand.vmem [shape: f32[8,128], index: 0, kind: input, shape index: {}]   ;;  %s254_s3 = inlined_call_operand.vmem [shape: f32[8,128], index: 3, kind: output, shape index: {}]  }
   0x1   :  { %132 = vmatprep.subr.mxu0 %v171_v0  ;;  %v30_v1 = vld [vmem:[%s251_s2 + $0x78] sm:$0xff]  ;;  %v29_v2 = vld [vmem:[%s251_s2 + $0x70] sm:$0xff]  ;;  %164 = vmatprep.mubr.msk.f32.mxu0 %vm172_vm0, %v171_v0  ;;  %v28_v4 = vld [vmem:[%s251_s2 + $0x68] sm:$0xff] }
   0x2   :  { %133 = vmatpush3.msra.mxu0 %v30_v1  ;;  %170 = vset.pattern.permute.xlu0 %v173_v3  ;;  %v27_v5 = vld [vmem:[%s251_s2 + $0x60] sm:$0xff]  ;;  %v26_v7 = vld [vmem:[%s251_s2 + $0x58] sm:$0xff]  ;;  %v25_v8 = vld [vmem:[%s251_s2 + $0x50] sm:$0xff] }
   0x3   :  { %134 = vmatprep.subr.mxu0 %v171_v0  ;;  %v31_v6 = vld [vmem:[%s252_s1] sm:$0xff]  ;;  %v24_v9 = vld [vmem:[%s251_s2 + $0x48] sm:$0xff]  ;;  %v22_v11 = vld [vmem:[%s251_s2 + $0x38] sm:$0xff] }
   0x4   :  { %135 = vmatpush3.msra.mxu0 %v29_v2  ;;  %34 = vperm.xlu0 %170, %v31_v6   ;;  %v23_v10 = vld [vmem:[%s251_s2 + $0x40] sm:$0xff]  ;;  %v21_v12 = vld [vmem:[%s251_s2 + $0x30] sm:$0xff]  ;;  %v20_v13 = vld [vmem:[%s251_s2 + $0x28] sm:$0xff] }
   0x5   :  { %136 = vmatprep.subr.mxu0 %v171_v0  ;;  %v19_v14 = vld [vmem:[%s251_s2 + $0x20] sm:$0xff]  ;;  %v18_v15 = vld [vmem:[%s251_s2 + $0x18] sm:$0xff]  ;;  %v17_v16 = vld [vmem:[%s251_s2 + $0x10] sm:$0xff] }
   0x6   :  { %137 = vmatpush3.msra.mxu0 %v28_v4  ;;  %v16_v17 = vld [vmem:[%s251_s2 + $0x8] sm:$0xff]  ;;  %v15_v18 = vld [vmem:[%s251_s2] sm:$0xff] }
   0x7   :  { %138 = vmatprep.subr.mxu0 %v171_v0  ;;  %v14_v19 = vld [vmem:[%s253_s0] sm:$0xff] }
   0x8   :  { %139 = vmatpush3.msra.mxu0 %v27_v5 }
   0x9   :  { %140 = vmatprep.subr.mxu0 %v171_v0 }
   0xa   :  { %141 = vmatpush3.msra.mxu0 %v26_v7 }
   0xb   :  { %142 = vmatprep.subr.mxu0 %v171_v0 }
   0xc   :  { %143 = vmatpush3.msra.mxu0 %v25_v8 }
   0xd   :  { %144 = vmatprep.subr.mxu0 %v171_v0 }
   0xe   :  { %145 = vmatpush3.msra.mxu0 %v24_v9 }
   0xf   :  { %146 = vmatprep.subr.mxu0 %v171_v0 }
  0x10   :  { %147 = vmatpush3.msra.mxu0 %v23_v10 }
  0x11   :  { %148 = vmatprep.subr.mxu0 %v171_v0 }
  0x12   :  { %149 = vmatpush3.msra.mxu0 %v22_v11 }
  0x13   :  { %150 = vmatprep.subr.mxu0 %v171_v0 }
  0x14   :  { %151 = vmatpush3.msra.mxu0 %v21_v12 }
  0x15   :  { %152 = vmatprep.subr.mxu0 %v171_v0 }
  0x16   :  { %153 = vmatpush3.msra.mxu0 %v20_v13 }
  0x17   :  { %154 = vmatprep.subr.mxu0 %v171_v0 }
  0x18   :  { %155 = vmatpush3.msra.mxu0 %v19_v14 }
  0x19   :  { %156 = vmatprep.subr.mxu0 %v171_v0 }
  0x1a   :  { %157 = vmatpush3.msra.mxu0 %v18_v15 }
  0x1b   :  { %158 = vmatprep.subr.mxu0 %v171_v0 }
  0x1c   :  { %159 = vmatpush3.msra.mxu0 %v17_v16 }
  0x1d   :  { %160 = vmatprep.subr.mxu0 %v171_v0 }
  0x1e   :  { %161 = vmatpush3.msra.mxu0 %v16_v17 }
  0x1f   :  { %162 = vmatprep.subr.mxu0 %v171_v0 }
  0x20   :  { %163 = vmatpush3.msra.mxu0 %v15_v18 }
  0x21   :  { %165 = vmatmul.mubr.f32.vlgmr.msra.gmra.mxu0 %v14_v19 }
  0x7f   :  { %v35_v20 = vpop.permute.xlu0 %34 }
  0xe1   :  { %v103_v21 = vpop.f32.mrf.mxu0 }
  0xe2   :  { %v104_v22 = vadd.f32 %v103_v21, %v35_v20 }
  0xe3   :  { %v166_v23 = vpop.f32.mrf.mxu0 }
  0xe4   :  { %vm107_vm1 = vcmp.ge.f32.partialorder %v104_v22, 0.0  ;;  %v108_v24 = vmul.f32 0.2, %v104_v22 }
  0xe6   :  { %v109_v25 = vsel %vm107_vm1, %v104_v22, %v108_v24 }
  0xe7   :  { %110 = vst [vmem:[%s254_s3] sm:$0xff] %v109_v25 }

</bundles_post_ra>
